<compile_context>
chip_gen: v7x
topology: tpu7x:2x2x1
jax: 0.10.0
libtpu: 0.0.40
codegen_flags: <defaults>
</compile_context>

<pallas_src>
import functools

import jax
import jax.numpy as jnp
from jax import lax
from jax.experimental import pallas as pl
from jax.experimental.pallas import tpu as pltpu

_TWO_PI = 6.283185307179586
_LANE_WIDTH = 512      # lane-dense 2D view width (4 vregs wide, halves stay 128-aligned)
_MAX_BLOCK_ROWS = 512  # (512, 512) f32 block = 1 MiB per buffer


def _round_up(a, b):
    return (a + b - 1) // b * b


def _bits_to_float_1_2(bits_i32, bitcast_fn):
    """int32 random bits -> float32 uniform in [1.0, 2.0) via the mantissa trick."""
    mant = jnp.bitwise_and(jnp.right_shift(bits_i32, 9), jnp.int32(0x007FFFFF))
    fbits = jnp.bitwise_or(mant, jnp.int32(0x3F800000))
    return bitcast_fn(fbits)


def _box_muller(f1, f2):
    """f1, f2 uniform in [1,2) -> two independent N(0,1) arrays (paired Box-Muller)."""
    u1 = 2.0 - f1                      # (0, 1] : strictly positive, safe for log
    u2 = f2 - 1.0                      # [0, 1)
    r = jnp.sqrt(-2.0 * jnp.log(u1))
    theta = _TWO_PI * u2
    return r * jnp.cos(theta), r * jnp.sin(theta)


def _add_noise(x_ref, o_ref, z1, z2, half_c, mean, stddev):
    xf = x_ref[...].astype(jnp.float32)
    m = jnp.float32(mean)
    s = jnp.float32(stddev)
    o_ref[:, :half_c] = (xf[:, :half_c] + (m + s * z1)).astype(o_ref.dtype)
    o_ref[:, half_c:] = (xf[:, half_c:] + (m + s * z2)).astype(o_ref.dtype)


def _gn_kernel_hw_prng(seed_ref, x_ref, o_ref, *, mean, stddev):
    """TPU path: noise generated on-chip with the hardware PRNG."""
    pltpu.prng_seed(seed_ref[0] + pl.program_id(0))   # independent stream per block
    rows, cols = x_ref.shape
    half_c = cols // 2
    raw = pltpu.prng_random_bits((rows, cols))
    bits = raw if raw.dtype == jnp.int32 else pltpu.bitcast(raw, jnp.int32)
    bc = lambda b: pltpu.bitcast(b, jnp.float32)
    z1, z2 = _box_muller(
        _bits_to_float_1_2(bits[:, :half_c], bc),
        _bits_to_float_1_2(bits[:, half_c:], bc),
    )
    _add_noise(x_ref, o_ref, z1, z2, half_c, mean, stddev)


def _gn_kernel_bits(x_ref, bits_ref, o_ref, *, mean, stddev):
    """Portable path (CPU fallback / interpret): random bits supplied as an input."""
    _, cols = x_ref.shape
    half_c = cols // 2
    bc = lambda b: lax.bitcast_convert_type(b, jnp.float32)
    z1, z2 = _box_muller(
        _bits_to_float_1_2(bits_ref[:, :half_c], bc),
        _bits_to_float_1_2(bits_ref[:, half_c:], bc),
    )
    _add_noise(x_ref, o_ref, z1, z2, half_c, mean, stddev)


def gaussian_noise(x, *, mean=0.0, stddev=0.0, seed=0, training=True):
    """JAX/Pallas equivalent of GaussianNoise.forward.

    training=True  -> x + Normal(mean, stddev) noise of x's shape
    training=False -> x unchanged
    """
    if not training:
        return x

    orig_shape = x.shape
    orig_dtype = x.dtype
    n = int(x.size)
    if n == 0:
        return x

    # Lane-dense 2D view (rows, 512); minimal tail padding, skipped when aligned.
    c = _LANE_WIDTH
    n_pad = _round_up(n, c)
    rows = n_pad // c

    flat = x.reshape(-1)
    if n_pad != n:
        flat = jnp.pad(flat, (0, n_pad - n))
    x2d = flat.reshape(rows, c)

    br = rows if rows <= _MAX_BLOCK_ROWS else _MAX_BLOCK_ROWS
    grid = (pl.cdiv(rows, br),)
    block = pl.BlockSpec((br, c), lambda i: (i, 0))
    out_shape = jax.ShapeDtypeStruct((rows, c), orig_dtype)
    cparams = pltpu.CompilerParams(dimension_semantics=("parallel",))

    if jax.default_backend() == "tpu":
        kernel = functools.partial(
            _gn_kernel_hw_prng, mean=float(mean), stddev=float(stddev)
        )
        seed_arr = jnp.asarray([seed], dtype=jnp.int32)
        out2d = pl.pallas_call(
            kernel,
            out_shape=out_shape,
            grid=grid,
            in_specs=[
                pl.BlockSpec(memory_space=pltpu.MemorySpace.SMEM),  # seed scalar
                block,
            ],
            out_specs=block,
            compiler_params=cparams,
        )(seed_arr, x2d)
    else:
        # pltpu.prng_* has no lowering off-TPU -> feed random bits instead.
        bits_u32 = jax.random.bits(jax.random.PRNGKey(seed), (rows, c), dtype=jnp.uint32)
        bits = lax.bitcast_convert_type(bits_u32, jnp.int32)
        kernel = functools.partial(
            _gn_kernel_bits, mean=float(mean), stddev=float(stddev)
        )
        out2d = pl.pallas_call(
            kernel,
            out_shape=out_shape,
            grid=grid,
            in_specs=[block, block],
            out_specs=block,
            compiler_params=cparams,
        )(x2d, bits)

    if n_pad != n:
        return out2d.reshape(-1)[:n].reshape(orig_shape)
    return out2d.reshape(orig_shape)


if __name__ == "__main__":
    # Module params (deterministic, set in-script): mean=0.5, stddev=0.1
    mean, stddev = 0.5, 0.1

    key = jax.random.PRNGKey(0)
    x = jax.random.normal(key, (2, 4, 16, 16), dtype=jnp.float32)  # NCHW

    # Training path: x + noise
    y_train = gaussian_noise(x, mean=mean, stddev=stddev, seed=0, training=True)
    y_train = jax.block_until_ready(y_train)
    assert y_train.shape == x.shape and y_train.dtype == x.dtype

    # Sanity: added noise has roughly the requested mean / stddev.
    delta = y_train - x
    assert abs(float(delta.mean()) - mean) < 0.05
    assert abs(float(delta.std()) - stddev) < 0.05

    # Eval path: identity
    y_eval = gaussian_noise(x, mean=mean, stddev=stddev, seed=0, training=False)
    y_eval = jax.block_until_ready(y_eval)
    assert bool(jnp.all(y_eval == x))

    print("KERNEL_OK")
</pallas_src>

<mosaic_0001>
module attributes {stable_mosaic.version = 11 : i64} {
  func.func @_gn_kernel_bits(%arg0: i32, %arg1: memref<4x512xf32, #tpu.memory_space<vmem>>, %arg2: memref<4x512xi32, #tpu.memory_space<vmem>>, %arg3: memref<4x512xf32, #tpu.memory_space<vmem>>) attributes {dimension_semantics = [#tpu.dimension_semantics<parallel>], iteration_bounds = array<i64: 1>, scalar_prefetch = 0 : i64, scratch_operands = 0 : i64, tpu.core_type = #tpu.core_type<tc>, window_params = [{transform_indices = @transform_0, window_bounds = array<i64: 4, 512>}, {transform_indices = @transform_1, window_bounds = array<i64: 4, 512>}, {transform_indices = @transform_2, window_bounds = array<i64: 4, 512>}]} {
    %c0 = arith.constant 0 : index
    %c0_0 = arith.constant 0 : index
    %0 = vector.load %arg2[%c0, %c0_0] : memref<4x512xi32, #tpu.memory_space<vmem>>, vector<4x256xi32>
    %c9_i32 = arith.constant 9 : i32
    %1 = vector.broadcast %c9_i32 : i32 to vector<4x256xi32>
    %2 = arith.shrsi %0, %1 : vector<4x256xi32>
    %c8388607_i32 = arith.constant 8388607 : i32
    %3 = vector.broadcast %c8388607_i32 : i32 to vector<4x256xi32>
    %4 = arith.andi %2, %3 : vector<4x256xi32>
    %c1065353216_i32 = arith.constant 1065353216 : i32
    %5 = vector.broadcast %c1065353216_i32 : i32 to vector<4x256xi32>
    %6 = arith.ori %4, %5 : vector<4x256xi32>
    %7 = tpu.bitcast %6 : vector<4x256xi32> -> vector<4x256xf32>
    %c0_1 = arith.constant 0 : index
    %c256 = arith.constant 256 : index
    %8 = vector.load %arg2[%c0_1, %c256] : memref<4x512xi32, #tpu.memory_space<vmem>>, vector<4x256xi32>
    %c9_i32_2 = arith.constant 9 : i32
    %9 = vector.broadcast %c9_i32_2 : i32 to vector<4x256xi32>
    %10 = arith.shrsi %8, %9 : vector<4x256xi32>
    %c8388607_i32_3 = arith.constant 8388607 : i32
    %11 = vector.broadcast %c8388607_i32_3 : i32 to vector<4x256xi32>
    %12 = arith.andi %10, %11 : vector<4x256xi32>
    %c1065353216_i32_4 = arith.constant 1065353216 : i32
    %13 = vector.broadcast %c1065353216_i32_4 : i32 to vector<4x256xi32>
    %14 = arith.ori %12, %13 : vector<4x256xi32>
    %15 = tpu.bitcast %14 : vector<4x256xi32> -> vector<4x256xf32>
    %cst = arith.constant 2.000000e+00 : f32
    %16 = vector.broadcast %cst : f32 to vector<4x256xf32>
    %17 = arith.subf %16, %7 : vector<4x256xf32>
    %cst_5 = arith.constant 1.000000e+00 : f32
    %18 = vector.broadcast %cst_5 : f32 to vector<4x256xf32>
    %19 = arith.subf %15, %18 : vector<4x256xf32>
    %20 = math.log %17 : vector<4x256xf32>
    %cst_6 = arith.constant -2.000000e+00 : f32
    %21 = vector.broadcast %cst_6 : f32 to vector<4x256xf32>
    %22 = arith.mulf %21, %20 : vector<4x256xf32>
    %23 = math.sqrt %22 : vector<4x256xf32>
    %cst_7 = arith.constant 6.28318548 : f32
    %24 = vector.broadcast %cst_7 : f32 to vector<4x256xf32>
    %25 = arith.mulf %24, %19 : vector<4x256xf32>
    %26 = math.cos %25 : vector<4x256xf32>
    %27 = arith.mulf %23, %26 : vector<4x256xf32>
    %28 = math.sin %25 : vector<4x256xf32>
    %29 = arith.mulf %23, %28 : vector<4x256xf32>
    %c0_8 = arith.constant 0 : index
    %c0_9 = arith.constant 0 : index
    %30 = vector.load %arg1[%c0_8, %c0_9] : memref<4x512xf32, #tpu.memory_space<vmem>>, vector<4x512xf32>
    %31 = vector.extract_strided_slice %30 {offsets = [0, 0], sizes = [4, 256], strides = [1, 1]} : vector<4x512xf32> to vector<4x256xf32>
    %cst_10 = arith.constant 1.000000e-01 : f32
    %32 = vector.broadcast %cst_10 : f32 to vector<4x256xf32>
    %33 = arith.mulf %32, %27 : vector<4x256xf32>
    %cst_11 = arith.constant 5.000000e-01 : f32
    %34 = vector.broadcast %cst_11 : f32 to vector<4x256xf32>
    %35 = arith.addf %34, %33 : vector<4x256xf32>
    %36 = arith.addf %31, %35 : vector<4x256xf32>
    %c0_12 = arith.constant 0 : index
    %c0_13 = arith.constant 0 : index
    %37 = vector.load %arg3[%c0_12, %c0_13] : memref<4x512xf32, #tpu.memory_space<vmem>>, vector<4x256xf32>
    tpu.vector_store %arg3[%c0_12, %c0_13], %36 {strides = array<i32>} : memref<4x512xf32, #tpu.memory_space<vmem>>, vector<4x256xf32>,
    %38 = vector.extract_strided_slice %30 {offsets = [0, 256], sizes = [4, 256], strides = [1, 1]} : vector<4x512xf32> to vector<4x256xf32>
    %cst_14 = arith.constant 1.000000e-01 : f32
    %39 = vector.broadcast %cst_14 : f32 to vector<4x256xf32>
    %40 = arith.mulf %39, %29 : vector<4x256xf32>
    %cst_15 = arith.constant 5.000000e-01 : f32
    %41 = vector.broadcast %cst_15 : f32 to vector<4x256xf32>
    %42 = arith.addf %41, %40 : vector<4x256xf32>
    %43 = arith.addf %38, %42 : vector<4x256xf32>
    %c0_16 = arith.constant 0 : index
    %c256_17 = arith.constant 256 : index
    %44 = vector.load %arg3[%c0_16, %c256_17] : memref<4x512xf32, #tpu.memory_space<vmem>>, vector<4x256xf32>
    tpu.vector_store %arg3[%c0_16, %c256_17], %43 {strides = array<i32>} : memref<4x512xf32, #tpu.memory_space<vmem>>, vector<4x256xf32>,
    return
  }
  func.func @transform_0(%arg0: i32) -> (i32, i32) {
    %c0_i32 = arith.constant 0 : i32
    %c0_i32_0 = arith.constant 0 : i32
    return %arg0, %c0_i32 : i32, i32
  }
  func.func @transform_1(%arg0: i32) -> (i32, i32) {
    %c0_i32 = arith.constant 0 : i32
    %c0_i32_0 = arith.constant 0 : i32
    return %arg0, %c0_i32 : i32, i32
  }
  func.func @transform_2(%arg0: i32) -> (i32, i32) {
    %c0_i32 = arith.constant 0 : i32
    %c0_i32_0 = arith.constant 0 : i32
    return %arg0, %c0_i32 : i32, i32
  }
}

</mosaic_0001>

<bundles_post_ra>
// kernel: tpu_custom_call.1
= control target key start
LH: loop header
LB: loop body
LE: loop exit
PB: predicated region body
PF: predicated region fallthrough
CT: control target
= control target key end

     0   :  { %7 = vsyncpa [#allocation3], 0  ;;  %s806_s0 = inlined_call_operand.hbm [shape: f32[4,512], index: 0, kind: input, shape index: {}]   ;;  %s807_s1 = inlined_call_operand.hbm [shape: s32[4,512], index: 1, kind: input, shape index: {}]   ;;  %s808_s2 = inlined_call_operand.hbm [shape: f32[4,512], index: 2, kind: output, shape index: {}]  }
   0x1   :  { %8 = vsyncpa [#allocation6], 0 }
   0x2   :  { %9 = vsyncpa [#allocation4], 0  ;;  %s657_s9 = smov [#allocation2]   ;;  %s658_s11 = smov [#allocation5]  }
   0x3   :  { %s16_s10 = sshll.u32 %s657_s9, 4  ;;  %s26_s12 = sshll.u32 %s658_s11, 4  ;;  %s17_s10 = int_to_ptr.vmem [resolvable:$true] %s16_s10  ;;  %s27_s12 = int_to_ptr.vmem [resolvable:$true] %s26_s12 }
   0x4   :  { %s585_s15 = scalar_lea.hbm %s806_s0, 256 }
   0x5   :  { %p586_p0 = scmp.ne.s32.totalorder %s806_s0, %s585_s15  ;;  %p589_p1 = scmp.lt.u32.totalorder %s585_s15, %s806_s0 }
   0x7   :  { %p591_p2 = pnand %p589_p1, %p586_p0 }
   0x9   :  { %594 = shalt.err (!%p591_p2)
}
   0xa   :  { %s595_s20 = scalar_lea.vmem %s17_s10, 256  ;;  %p600_p4 = scmp.lt.s32.totalorder %s17_s10, %s17_s10 }
   0xb   :  { %p596_p3 = scmp.ne.s32.totalorder %s17_s10, %s595_s20  ;;  %p601_p5 = scmp.lt.s32.totalorder %s595_s20, %s595_s20 }
   0xd   :  { %p602_p6 = por %p601_p5, %p600_p4 }
   0xf   :  { %p603_p7 = pnand %p602_p6, %p596_p3 }
  0x11   :  { %606 = shalt.err (!%p603_p7)
}
  0x12   :  { %19 = dma.hbm_to_vmem [thread:$0]  %s806_s0, 256, %s17_s10, [#allocation3]  }
  0x13   :  { %s607_s25 = scalar_lea.hbm %s807_s1, 256 }
  0x14   :  { %p608_p8 = scmp.ne.s32.totalorder %s807_s1, %s607_s25  ;;  %p611_p9 = scmp.lt.u32.totalorder %s607_s25, %s807_s1 }
  0x16   :  { %p613_p10 = pnand %p611_p9, %p608_p8 }
  0x18   :  { %616 = shalt.err (!%p613_p10)
}
  0x19   :  { %s617_s30 = scalar_lea.vmem %s27_s12, 256  ;;  %p622_p12 = scmp.lt.s32.totalorder %s27_s12, %s27_s12 }
  0x1a   :  { %p618_p11 = scmp.ne.s32.totalorder %s27_s12, %s617_s30  ;;  %p623_p13 = scmp.lt.s32.totalorder %s617_s30, %s617_s30 }
  0x1c   :  { %p624_p0 = por %p623_p13, %p622_p12 }
  0x1e   :  { %p625_p1 = pnand %p624_p0, %p618_p11 }
  0x20   :  { %628 = shalt.err (!%p625_p1)
}
  0x21   :  { %29 = dma.hbm_to_vmem [thread:$0]  %s807_s1, 256, %s27_s12, [#allocation6]  }
  0x22   :  { %651 = dma.done.wait [#allocation3], 256  }
  0x23   :  { %652 = vsyncadd [#allocation3], 4294967040 }
  0x24   :  { %653 = dma.done.wait [#allocation6], 256  }
  0x25   :  { %654 = vsyncadd [#allocation6], 4294967040  ;;  %v43_v0 = vld [vmem:[#allocation5 + $0x8] sm:$0xff]  ;;  %v659_v23 = vmov 683565275   ;;  %s665_s1 = smov [#allocation7]  }
  0x26   :  { %v533_v1 = vshrl.u32 %v43_v0, 9  ;;  %v660_v25 = vmov 2475754826   ;;  %v661_v31 = vmov 2131351028   ;;  %s522_s4 = sshll.u32 %s665_s1, 4  ;;  %s523_s4 = int_to_ptr.vmem [resolvable:$true] %s522_s4 }
  0x27   :  { %v662_v34 = vmov 2102212464   ;;  %v663_v37 = vmov 920167782   ;;  %v664_v42 = vmov 1326507024   ;;  %p634_p3 = scmp.lt.s32.totalorder %s523_s4, %s523_s4 }
  0x28   :  { %v46_v2 = vor.u32 1065353216, %v533_v1  ;;  %s629_s5 = scalar_lea.vmem %s523_s4, 256 }
  0x29   :  { %p630_p2 = scmp.ne.s32.totalorder %s523_s4, %s629_s5  ;;  %p635_p4 = scmp.lt.s32.totalorder %s629_s5, %s629_s5 }
  0x2a   :  { %v47_v3 = vcombine.high %v46_v2, %v46_v2  ;;  %v534_v4 = vadd.f32 -1.0, %v46_v2 }
  0x2b   :  { %p636_p5 = por %p635_p4, %p634_p3 }
  0x2c   :  { %v535_v5 = vadd.f32 -1.0, %v47_v3  ;;  %v705_v6 = vmul.f32 6.2831855, %v534_v4  ;;  %v36_v3 = vld [vmem:[#allocation5] sm:$0xff] }
  0x2d   :  { %p637_p6 = pnand %p636_p5, %p630_p2 }
  0x2e   :  { %v707_v7 = vmul.f32 6.2831855, %v535_v5  ;;  %v79_v8 = vand.u32 2139095040, %v705_v6  ;;  %v76_v9 = vand.u32 2147483647, %v705_v6  ;;  %vm78_vm13 = vcmp.lt.s32.totalorder %v705_v6, 0 }
  0x30   :  { %v80_v10 = vshrl.u32 %v79_v8, 23  ;;  %v182_v11 = vand.u32 2139095040, %v707_v7  ;;  %v83_v14 = vand.u32 8388607, %v76_v9  ;;  %v179_v28 = vand.u32 2147483647, %v707_v7 }
  0x31   :  { %vm760_vm14 = vcmp.le.f32.partialorder %v76_v9, 0.7853982 }
  0x32   :  { %v536_v12 = vadd.s32 4294967169, %v80_v10  ;;  %v183_v13 = vshrl.u32 %v182_v11, 23  ;;  %v84_v18 = vor.u32 8388608, %v83_v14  ;;  %v186_v58 = vand.u32 8388607, %v179_v28 }
  0x34   :  { %v86_v15 = vadd.s32 1, %v536_v12  ;;  %v540_v16 = vadd.s32 4294967169, %v183_v13  ;;  %v714_v27 = vshll.u32 %v84_v18, 8  ;;  %v187_v10 = vor.u32 8388608, %v186_v58 }
  0x36   :  { %vm87_vm0 = vcmp.gt.s32.totalorder %v86_v15, 0  ;;  %v189_v20 = vadd.s32 1, %v540_v16 }
  0x37   :  { %v88_v17 = vsel %vm87_vm0, %v86_v15, 0  ;;  %vm181_vm0 = vcmp.lt.s32.totalorder %v707_v7, 0 }
  0x38   :  { %v90_v19 = vand.u32 31, %v88_v17  ;;  %v89_v21 = vshrl.u32 %v88_v17, 5  ;;  %vm190_vm1 = vcmp.gt.s32.totalorder %v189_v20, 0  ;;  %v532_v17 = vshrl.u32 %v36_v3, 9 }
  0x39   :  { %v191_v52 = vsel %vm190_vm1, %v189_v20, 0  ;;  %vm180_vm1 = vcmp.le.f32.partialorder %v179_v28, 0.7853982 }
  0x3a   :  { %v91_v22 = vsub.s32 32, %v90_v19  ;;  %v93_v24 = vshll.u32 %v659_v23, %v90_v19  ;;  %v96_v26 = vshll.u32 %v660_v25, %v90_v19  ;;  %v99_v33 = vshll.u32 %v661_v31, %v90_v19 }
  0x3b   :  { %v102_v36 = vshll.u32 %v662_v34, %v90_v19  ;;  %v105_v39 = vshll.u32 %v663_v37, %v90_v19  ;;  %vm108_vm2 = vcmp.lt.s32.totalorder %v89_v21, 1  ;;  %vm109_vm3 = vcmp.lt.s32.totalorder %v89_v21, 2 }
  0x3c   :  { %v92_v29 = vshrl.u32 %v659_v23, %v91_v22  ;;  %v94_v30 = vshrl.u32 %v660_v25, %v91_v22  ;;  %v97_v32 = vshrl.u32 %v661_v31, %v91_v22  ;;  %v100_v35 = vshrl.u32 %v662_v34, %v91_v22 }
  0x3d   :  { %v103_v38 = vshrl.u32 %v663_v37, %v91_v22  ;;  %v106_v43 = vshrl.u32 %v664_v42, %v91_v22  ;;  %vm110_vm4 = vcmp.lt.s32.totalorder %v89_v21, 3  ;;  %vm111_vm5 = vcmp.lt.s32.totalorder %v89_v21, 4 }
  0x3e   :  { %v95_v40 = vor.u32 %v94_v30, %v93_v24  ;;  %v98_v41 = vor.u32 %v97_v32, %v96_v26  ;;  %v101_v44 = vor.u32 %v100_v35, %v99_v33  ;;  %v193_v59 = vand.u32 31, %v191_v52 }
  0x3f   :  { %v104_v45 = vor.u32 %v103_v38, %v102_v36  ;;  %v107_v46 = vor.u32 %v106_v43, %v105_v39  ;;  %v192_v14 = vshrl.u32 %v191_v52, 5  ;;  %v227_v30 = vshll.u32 %v187_v10, 8 }
  0x40   :  { %v112_v47 = vsel %vm108_vm2, %v92_v29, %v95_v40  ;;  %v116_v48 = vsel %vm108_vm2, %v95_v40, %v98_v41  ;;  %v113_v49 = vsel %vm111_vm5, %v101_v44, 2102212464  ;;  %v120_v51 = vsel %vm108_vm2, %v98_v41, %v101_v44 }
  0x41   :  { %v117_v50 = vsel %vm111_vm5, %v104_v45, 920167782  ;;  %v114_v53 = vsel %vm110_vm4, %v98_v41, %v113_v49  ;;  %v121_v55 = vsel %vm111_vm5, %v107_v46, 1326507024  ;;  %v194_v2 = vsub.s32 32, %v193_v59 }
  0x42   :  { %v118_v54 = vsel %vm110_vm4, %v101_v44, %v117_v50  ;;  %v122_v57 = vsel %vm110_vm4, %v104_v45, %v121_v55  ;;  %v115_v60 = vsel %vm109_vm3, %v112_v47, %v114_v53  ;;  %v196_v4 = vshll.u32 %v659_v23, %v193_v59 }
  0x43   :  { %v119_v56 = vsel %vm109_vm3, %v116_v48, %v118_v54  ;;  %v123_v61 = vsel %vm109_vm3, %v120_v51, %v122_v57  ;;  %v199_v5 = vshll.u32 %v660_v25, %v193_v59  ;;  %v131_v8 = vmul.u32 %v714_v27, %v115_v60 }
  0x44   :  { %v724_v62 = vmul.u32.u64.low %v714_v27, %v119_v56  ;;  %v725_v63 = vmul.u32.u64.high %v714_v27, %v119_v56, %v724_v62  ;;  %v729_v0 = vmul.u32.u64.low %v714_v27, %v123_v61  ;;  %v730_v1 = vmul.u32.u64.high %v714_v27, %v123_v61, %v729_v0 }
  0x45   :  { %v197_v11 = vshrl.u32 %v660_v25, %v194_v2  ;;  %v200_v12 = vshrl.u32 %v661_v31, %v194_v2  ;;  %v202_v15 = vshll.u32 %v661_v31, %v193_v59  ;;  %v203_v16 = vshrl.u32 %v662_v34, %v194_v2 }
  0x46   :  { %v134_v13 = vadd.s32 1, %v725_v63  ;;  %vm133_vm6 = vc.u32 %v730_v1, %v724_v62  ;;  %v195_v18 = vshrl.u32 %v659_v23, %v194_v2  ;;  %v205_v24 = vshll.u32 %v662_v34, %v193_v59 }
  0x47   :  { %v198_v19 = vor.u32 %v197_v11, %v196_v4  ;;  %v201_v21 = vor.u32 %v200_v12, %v199_v5  ;;  %v204_v22 = vor.u32 %v203_v16, %v202_v15  ;;  %v206_v27 = vshrl.u32 %v663_v37, %v194_v2 }
  0x48   :  { %v135_v20 = vsel %vm133_vm6, %v134_v13, %v725_v63  ;;  %v208_v25 = vshll.u32 %v663_v37, %v193_v59  ;;  %v209_v29 = vshrl.u32 %v664_v42, %v194_v2  ;;  %vm211_vm7 = vcmp.lt.s32.totalorder %v192_v14, 1 }
  0x49   :  { %v136_v26 = vadd.s32 %v135_v20, %v131_v8  ;;  %vm212_vm8 = vcmp.lt.s32.totalorder %v192_v14, 2  ;;  %vm214_vm9 = vcmp.lt.s32.totalorder %v192_v14, 4  ;;  %v207_v32 = vor.u32 %v206_v27, %v205_v24 }
  0x4a   :  { %v210_v33 = vor.u32 %v209_v29, %v208_v25  ;;  %vm213_vm10 = vcmp.lt.s32.totalorder %v192_v14, 3  ;;  %v215_v35 = vsel %vm211_vm7, %v195_v18, %v198_v19  ;;  %v216_v23 = vsel %vm214_vm9, %v204_v22, 2102212464 }
  0x4b   :  { %v137_v31 = vadd.s32 536870912, %v136_v26  ;;  %v219_v36 = vsel %vm211_vm7, %v198_v19, %v201_v21  ;;  %v223_v38 = vsel %vm211_vm7, %v201_v21, %v204_v22  ;;  %v217_v40 = vsel %vm213_vm10, %v201_v21, %v216_v23 }
  0x4c   :  { %v220_v34 = vsel %vm214_vm9, %v207_v32, 920167782  ;;  %v224_v41 = vsel %vm214_vm9, %v210_v33, 1326507024  ;;  %v218_v44 = vsel %vm212_vm8, %v215_v35, %v217_v40  ;;  %v39_v51 = vor.u32 1065353216, %v532_v17 }
  0x4d   :  { %v737_v39 = vshrl.u32 %v137_v31, 30  ;;  %v221_v43 = vsel %vm213_vm10, %v204_v22, %v220_v34  ;;  %v225_v37 = vsel %vm213_vm10, %v207_v32, %v224_v41  ;;  %v234_v55 = vmul.u32 %v227_v30, %v218_v44 }
  0x4e   :  { %v222_v45 = vsel %vm212_vm8, %v219_v36, %v221_v43  ;;  %v226_v46 = vsel %vm212_vm8, %v223_v38, %v225_v37  ;;  %v50_v53 = vsub.f32 2.0, %v39_v51  ;;  %v40_v59 = vcombine.high %v39_v51, %v39_v51 }
  0x4f   :  { %v139_v42 = vshll.u32 %v737_v39, 30  ;;  %v743_v47 = vmul.u32.u64.low %v227_v30, %v226_v46  ;;  %v744_v48 = vmul.u32.u64.high %v227_v30, %v226_v46, %v743_v47  ;;  %v132_v3 = vadd.s32 %v724_v62, %v730_v1 }
  0x50   :  { %v746_v49 = vmul.u32.u64.low %v227_v30, %v222_v45  ;;  %v747_v50 = vmul.u32.u64.high %v227_v30, %v222_v45, %v746_v49  ;;  %569 = vlog2.f32 %v50_v53  ;;  %v51_v2 = vsub.f32 2.0, %v40_v59 }
  0x51   :  { %v140_v52 = vsub.s32 %v136_v26, %v139_v42  ;;  %v162_v29 = vsub.s32 4, %v737_v39  ;;  %vm168_vm9 = vweird.f32 %v705_v6 }
  0x52   :  { %vm236_vm11 = vc.u32 %v744_v48, %v746_v49  ;;  %v237_v56 = vadd.s32 1, %v747_v50  ;;  %571 = vlog2.f32 %v51_v2  ;;  %v235_v33 = vadd.s32 %v746_v49, %v744_v48 }
  0x53   :  { %v142_v54 = vsub.s32 0, %v140_v52  ;;  %v163_v41 = vsel %vm78_vm13, %v162_v29, %v737_v39 }
  0x54   :  { %v238_v58 = vsel %vm236_vm11, %v237_v56, %v747_v50  ;;  %v165_v42 = vsel %vm760_vm14, 0, %v163_v41 }
  0x55   :  { %v537_v57 = vmin.u32 %v142_v54, %v140_v52  ;;  %v239_v61 = vadd.s32 %v238_v58, %v234_v55  ;;  %v377_v50 = vadd.s32 3, %v165_v42  ;;  %v169_v51 = vand.u32 3, %v165_v42 }
  0x57   :  { %v144_v60 = vclz %v537_v57  ;;  %v240_v0 = vadd.s32 536870912, %v239_v61  ;;  %v378_v55 = vand.u32 3, %v377_v50  ;;  %vm171_vm2 = vcmp.eq.s32.totalorder %v169_v51, 0 }
  0x58   :  { %vm174_vm3 = vcmp.eq.s32.totalorder %v169_v51, 2  ;;  %vm170_vm7 = vcmp.lt.s32.totalorder %v169_v51, 2 }
  0x59   :  { %v538_v63 = vadd.s32 4294967294, %v144_v60  ;;  %v241_v4 = vshrl.u32 %v240_v0, 30  ;;  %vm380_vm4 = vcmp.eq.s32.totalorder %v378_v55, 0  ;;  %vm383_vm5 = vcmp.eq.s32.totalorder %v378_v55, 2 }
  0x5a   :  { %v570_v16 = vpop.eup %569  ;;  %vm379_vm8 = vcmp.lt.s32.totalorder %v378_v55, 2 }
  0x5b   :  { %vm539_vm12 = vcmp.lt.s32.totalorder %v538_v63, 0  ;;  %v242_v12 = vshll.u32 %v241_v4, 30  ;;  %v55_v24 = vmul.f32 0.6931472, %v570_v16  ;;  %v265_v49 = vsub.s32 4, %v241_v4 }
  0x5c   :  { %v147_v5 = vsel %vm539_vm12, 0, %v538_v63  ;;  %v572_v30 = vpop.eup %571 }
  0x5d   :  { %v148_v8 = vsub.s32 32, %v147_v5  ;;  %v149_v10 = vshll.u32 %v140_v52, %v147_v5  ;;  %v152_v11 = vsub.s32 4294967266, %v147_v5  ;;  %v243_v15 = vsub.s32 %v239_v61, %v242_v12 }
  0x5e   :  { %v754_v25 = vmul.f32 -2.0, %v55_v24  ;;  %v57_v34 = vmul.f32 0.6931472, %v572_v30  ;;  %v266_v54 = vsel %vm181_vm0, %v265_v49, %v241_v4 }
  0x5f   :  { %v150_v13 = vshrl.u32 %v132_v3, %v148_v8  ;;  %v153_v14 = vadd.s32 127, %v152_v11  ;;  %v245_v19 = vsub.s32 0, %v243_v15  ;;  %v268_v63 = vsel %vm180_vm1, 0, %v266_v54 }
  0x60   :  { %573 = vrsqrt.f32 %v754_v25  ;;  %v772_v46 = vmul.f32 -2.0, %v57_v34  ;;  %vm62_vm6 = vcmp.eq.f32.partialorder %v754_v25, inf  ;;  %v481_v28 = vadd.s32 3, %v268_v63 }
  0x61   :  { %v151_v17 = vor.u32 %v150_v13, %v149_v10  ;;  %v154_v18 = vshll.u32 %v153_v14, 23  ;;  %v541_v22 = vmin.u32 %v245_v19, %v243_v15  ;;  %v65_v11 = vand.u32 2147483648, %v754_v25 }
  0x62   :  { %vm64_vm10 = vcmp.eq.f32.partialorder %v754_v25, 0.0  ;;  %v272_v16 = vand.u32 3, %v268_v63  ;;  %vm69_vm11 = vcmp.eq.f32.partialorder %v772_v46, inf  ;;  %vm71_vm12 = vcmp.eq.f32.partialorder %v772_v46, 0.0 }
  0x63   :  { %v155_v20 = vor.u32 4788187, %v154_v18  ;;  %v158_v21 = vcvt.s32.f32 %v151_v17  ;;  %v247_v1 = vclz %v541_v22  ;;  %v482_v17 = vand.u32 3, %v481_v28 }
  0x65   :  { %v156_v62 = vand.u32 2147483647, %v155_v20  ;;  %v542_v27 = vadd.s32 4294967294, %v247_v1 }
  0x67   :  { %v159_v26 = vmul.f32 %v158_v21, %v156_v62  ;;  %vm543_vm15 = vcmp.lt.s32.totalorder %v542_v27, 0  ;;  %v72_v21 = vand.u32 2147483648, %v772_v46 }
  0x68   :  { %v250_v35 = vsel %vm543_vm15, 0, %v542_v27  ;;  %vm487_vm15 = vcmp.eq.s32.totalorder %v482_v17, 2 }
  0x69   :  { %v160_v32 = vxor.u32 2147483648, %v159_v26  ;;  %v251_v36 = vsub.s32 32, %v250_v35  ;;  %v252_v38 = vshll.u32 %v243_v15, %v250_v35  ;;  %v255_v40 = vsub.s32 4294967266, %v250_v35 }
  0x6a   :  { %v574_v53 = vpop.eup %573 }
  0x6b   :  { %v161_v23 = vsel %vm78_vm13, %v160_v32, %v159_v26  ;;  %v253_v43 = vshrl.u32 %v235_v33, %v251_v36  ;;  %v256_v37 = vadd.s32 127, %v255_v40  ;;  %v61_v2 = vmul.f32 %v574_v53, %v754_v25 }
  0x6c   :  { %v164_v9 = vsel %vm760_vm14, %v705_v6, %v161_v23  ;;  %vm274_vm13 = vcmp.eq.s32.totalorder %v272_v16, 0  ;;  %vm277_vm14 = vcmp.eq.s32.totalorder %v272_v16, 2 }
  0x6d   :  { %575 = vcosq.f32 %v164_v9  ;;  %v254_v44 = vor.u32 %v253_v43, %v252_v38  ;;  %v257_v45 = vshll.u32 %v256_v37, 23  ;;  %v63_v12 = vsel %vm62_vm6, %v754_v25, %v61_v2 }
  0x6e   :  { %577 = vsinq.f32 %v164_v9  ;;  %v66_v18 = vsel %vm64_vm10, %v65_v11, %v63_v12 }
  0x6f   :  { %v258_v47 = vor.u32 4788187, %v257_v45  ;;  %v261_v48 = vcvt.s32.f32 %v254_v44  ;;  %579 = vrsqrt.f32 %v772_v46  ;;  %v494_v45 = vld [vmem:[#allocation2] sm:$0xff] }
  0x71   :  { %v259_v39 = vand.u32 2147483647, %v258_v47  ;;  %v495_v47 = vld [vmem:[#allocation2 + $0x8] sm:$0xff] }
  0x73   :  { %v262_v52 = vmul.f32 %v261_v48, %v259_v39 }
  0x75   :  { %v263_v57 = vxor.u32 2147483648, %v262_v52 }
  0x77   :  { %v576_v56 = vpop.eup %575  ;;  %v264_v61 = vsel %vm181_vm0, %v263_v57, %v262_v52  ;;  %vm484_vm0 = vcmp.eq.s32.totalorder %v482_v17, 0 }
  0x78   :  { %v578_v58 = vpop.eup %577  ;;  %v175_v60 = vxor.u32 2147483648, %v576_v56  ;;  %v267_v0 = vsel %vm180_vm1, %v707_v7, %v264_v61  ;;  %vm273_vm1 = vcmp.lt.s32.totalorder %v272_v16, 2 }
  0x79   :  { %v172_v59 = vxor.u32 2147483648, %v578_v58  ;;  %581 = vcosq.f32 %v267_v0  ;;  %v580_v10 = vpop.eup %579 }
  0x7a   :  { %583 = vsinq.f32 %v267_v0  ;;  %v176_v4 = vsel %vm174_vm3, %v175_v60, %v578_v58  ;;  %v385_v8 = vsel %vm383_vm5, %v175_v60, %v578_v58  ;;  %v68_v15 = vmul.f32 %v580_v10, %v772_v46 }
  0x7b   :  { %v173_v3 = vsel %vm171_vm2, %v576_v56, %v172_v59  ;;  %v382_v5 = vsel %vm380_vm4, %v576_v56, %v172_v59  ;;  %vm483_vm2 = vcmp.lt.s32.totalorder %v482_v17, 2  ;;  %vm271_vm3 = vweird.f32 %v707_v7 }
  0x7c   :  { %v177_v13 = vsel %vm170_vm7, %v173_v3, %v176_v4  ;;  %v386_v14 = vsel %vm379_vm8, %v382_v5, %v385_v8  ;;  %v70_v22 = vsel %vm69_vm11, %v772_v46, %v68_v15 }
  0x7d   :  { %v178_v19 = vsel %vm168_vm9, nan, %v177_v13  ;;  %v387_v20 = vsel %vm168_vm9, nan, %v386_v14  ;;  %v73_v30 = vsel %vm71_vm12, %v72_v21, %v70_v22 }
  0x7e   :  { %v282_v1 = vmul.f32 %v178_v19, %v66_v18  ;;  %v492_v26 = vmul.f32 %v387_v20, %v66_v18 }
  0x80   :  { %v496_v23 = vmul.f32 0.1, %v282_v1  ;;  %v506_v36 = vmul.f32 0.1, %v492_v26 }
  0x82   :  { %v498_v43 = vadd.f32 0.5, %v496_v23  ;;  %v508_v42 = vadd.f32 0.5, %v506_v36 }
  0x83   :  { %v582_v6 = vpop.eup %581 }
  0x84   :  { %v584_v24 = vpop.eup %583  ;;  %v278_v62 = vxor.u32 2147483648, %v582_v6 }
  0x85   :  { %v275_v27 = vxor.u32 2147483648, %v584_v24 }
  0x86   :  { %v279_v25 = vsel %vm277_vm14, %v278_v62, %v584_v24  ;;  %v489_v29 = vsel %vm487_vm15, %v278_v62, %v584_v24 }
  0x87   :  { %v276_v31 = vsel %vm274_vm13, %v582_v6, %v275_v27  ;;  %v486_v32 = vsel %vm484_vm0, %v582_v6, %v275_v27 }
  0x88   :  { %v280_v33 = vsel %vm273_vm1, %v276_v31, %v279_v25  ;;  %v490_v35 = vsel %vm483_vm2, %v486_v32, %v489_v29 }
  0x89   :  { %v281_v38 = vsel %vm271_vm3, nan, %v280_v33  ;;  %v491_v40 = vsel %vm271_vm3, nan, %v490_v35 }
  0x8a   :  { %v283_v34 = vmul.f32 %v281_v38, %v73_v30  ;;  %v493_v41 = vmul.f32 %v491_v40, %v73_v30 }
  0x8c   :  { %v497_v9 = vmul.f32 0.1, %v283_v34  ;;  %v507_v37 = vmul.f32 0.1, %v493_v41 }
  0x8e   :  { %v499_v7 = vadd.f32 0.5, %v497_v9  ;;  %v509_v44 = vadd.f32 0.5, %v507_v37 }
  0x90   :  { %v502_v46 = vcombine.low %v498_v43, %v499_v7  ;;  %v512_v48 = vcombine.low %v508_v42, %v509_v44 }
  0x92   :  { %v504_v49 = vadd.f32 %v502_v46, %v494_v45  ;;  %v514_v50 = vadd.f32 %v512_v48, %v495_v47 }
  0x94   :  { %505 = vst [vmem:[#allocation7] sm:$0xff] %v504_v49  ;;  %515 = vst [vmem:[#allocation7 + $0x8] sm:$0xff] %v514_v50 }
  0x95   :  { %640 = shalt.err (!%p637_p6)
}
  0x96   :  { %s641_s8 = scalar_lea.hbm %s808_s2, 256 }
  0x97   :  { %p642_p7 = scmp.ne.s32.totalorder %s808_s2, %s641_s8  ;;  %p645_p8 = scmp.lt.u32.totalorder %s641_s8, %s808_s2 }
  0x99   :  { %p647_p9 = pnand %p645_p8, %p642_p7 }
  0x9b   :  { %650 = shalt.err (!%p647_p9)
}
  0x9c   :  { %525 = dma.vmem_to_hbm [thread:$0]  %s523_s4, 256, %s808_s2, [#allocation4]  }
  0x9d   :  { %655 = dma.done.wait [#allocation4], 256  }
  0x9e   :  { %656 = vsyncadd [#allocation4], 4294967040 }
  0x9f   :  { %529 = vsyncpa [#allocation3], 1 }
  0xa0   :  { %530 = vsyncpa [#allocation6], 1 }
  0xa1   :  { %531 = vsyncpa [#allocation4], 1 }

</bundles_post_ra>
